<compile_context>
chip_gen: v7x
topology: tpu7x:2x2x1
jax: 0.10.0
libtpu: 0.0.40
codegen_flags: <defaults>
</compile_context>

<pallas_src>
import jax
import jax.numpy as jnp
from jax.experimental import pallas as pl
from jax.experimental.pallas import tpu as pltpu

_LANES = 128


def _round_up(n, m):
    return ((n + m - 1) // m) * m


# --------------------------------------------------------------------------
# Pallas kernel
# --------------------------------------------------------------------------

def _h_sigmoid_kernel(x_ref, o_ref):
    """Elementwise h_sigmoid on one (tm, 128) tile: relu6(x + 3) / 6."""
    x = x_ref[...].astype(jnp.float32)          # widen in-vreg (free, mem-bound)
    y = jnp.clip(x + 3.0, 0.0, 6.0) * (1.0 / 6.0)
    o_ref[...] = y.astype(o_ref.dtype)


# --------------------------------------------------------------------------
# Wrapper
# --------------------------------------------------------------------------

def h_sigmoid(x, *, tile_rows=4096, donate=False):
    """h_sigmoid over an arbitrarily-shaped array via a lane-dense tiled kernel.

    The array is viewed as a (rows, 128) slab; rows are tiled with a 1-D
    'parallel' grid. The aligned path (total % 128 == 0) does no padding and
    no output slicing.
    """
    orig_shape = x.shape
    dtype = x.dtype
    total = int(x.size)
    if total == 0:
        return x

    itemsize = jnp.dtype(dtype).itemsize
    # dtype-aware sublane multiple: 8 (f32), 16 (bf16/f16), 32 (int8/fp8)
    sub = max(8, 32 // max(1, itemsize))

    xf = x.reshape(-1)
    rows = pl.cdiv(total, _LANES)
    aligned = (total == rows * _LANES)
    if not aligned:
        # Only misaligned totals pay the pad / slice HBM round trip.
        xf = jnp.pad(xf, (0, rows * _LANES - total))
    x2 = xf.reshape(rows, _LANES)

    # ---- tile-size selection ----------------------------------------------
    rows_floor = (rows // sub) * sub
    if rows_floor == 0:
        # Tiny input: one block equal to the full array dims (allowed).
        tm = rows
    else:
        # Keep 2x double-buffered (in + out) blocks under ~40 MiB total so we
        # fit v7x's 64 MiB physical VMEM with headroom.
        vmem_budget = 40 * 1024 * 1024
        tm_cap_vmem = max(sub, (vmem_budget // (4 * _LANES * itemsize)) // sub * sub)
        tm = max(sub, (min(int(tile_rows), tm_cap_vmem) // sub) * sub)
        # Keep the 'parallel' grid around >= 8 steps (v7x: 2 TCs share it),
        # but never shrink below ~sub*32 rows where per-step overhead returns.
        min_tm = min(rows_floor, 32 * sub)
        occ_tm = max(min_tm, _round_up(pl.cdiv(rows, 8), sub))
        tm = min(tm, occ_tm, rows_floor)

    grid = (pl.cdiv(rows, tm),)                 # ragged last block handled by Pallas

    block_bytes = tm * _LANES * itemsize
    vmem_limit = min(48 * 1024 * 1024,
                     max(32 * 1024 * 1024, 4 * block_bytes + 8 * 1024 * 1024))

    cost = pl.CostEstimate(
        flops=3 * rows * _LANES,
        transcendentals=0,
        bytes_accessed=2 * rows * _LANES * itemsize,
    )

    extra = {"input_output_aliases": {0: 0}} if donate else {}

    out2 = pl.pallas_call(
        _h_sigmoid_kernel,
        grid=grid,
        out_shape=jax.ShapeDtypeStruct((rows, _LANES), dtype),
        in_specs=[pl.BlockSpec((tm, _LANES), lambda i: (i, 0))],
        out_specs=pl.BlockSpec((tm, _LANES), lambda i: (i, 0)),
        compiler_params=pltpu.CompilerParams(
            dimension_semantics=("parallel",),
            vmem_limit_bytes=vmem_limit,
        ),
        cost_estimate=cost,
        **extra,
    )(x2)

    if aligned:
        return out2.reshape(orig_shape)
    return out2.reshape(-1)[:total].reshape(orig_shape)


# --------------------------------------------------------------------------

def _ref(x):
    xf = x.astype(jnp.float32)
    return (jnp.clip(xf + 3.0, 0.0, 6.0) * (1.0 / 6.0)).astype(x.dtype)


if __name__ == "__main__":
    key = jax.random.PRNGKey(0)
    k1, k2, k3 = jax.random.split(key, 3)

    # 1) Small NCHW f32 input (aligned path, single block).
    x = jax.random.normal(k1, (2, 4, 16, 16), dtype=jnp.float32) * 4.0
    out = jax.block_until_ready(h_sigmoid(x))
    assert out.shape == x.shape
    assert jnp.all(jnp.isfinite(out))
    assert jnp.allclose(out, _ref(x), atol=1e-6, rtol=1e-6)

    # 2) Same input with a tiny tile -> multi-step grid (16 rows / tm=8 -> 2 steps).
    out = jax.block_until_ready(h_sigmoid(x, tile_rows=8))
    assert jnp.allclose(out, _ref(x), atol=1e-6, rtol=1e-6)

    # 3) Ragged last block: 3072 elems -> 24 rows, tm=16 -> grid=(2,), overhang.
    xr = jax.random.normal(k2, (2, 3, 16, 32), dtype=jnp.float32) * 4.0
    out = jax.block_until_ready(h_sigmoid(xr, tile_rows=16))
    assert out.shape == xr.shape
    assert jnp.allclose(out, _ref(xr), atol=1e-6, rtol=1e-6)

    # 4) Misaligned total (pad/slice path) + bf16 (f32 compute inside kernel).
    xm = (jax.random.normal(k3, (3, 5, 7), dtype=jnp.float32) * 4.0).astype(jnp.bfloat16)
    out = jax.block_until_ready(h_sigmoid(xm))
    assert out.shape == xm.shape
    assert jnp.allclose(out.astype(jnp.float32), _ref(xm).astype(jnp.float32),
                        atol=1e-2, rtol=1e-2)

    print("KERNEL_OK")
</pallas_src>

<mosaic_0001>
module attributes {stable_mosaic.version = 11 : i64} {
  func.func @_h_sigmoid_kernel(%arg0: i32, %arg1: memref<16x128xf32, #tpu.memory_space<vmem>>, %arg2: memref<16x128xf32, #tpu.memory_space<vmem>>) attributes {dimension_semantics = [#tpu.dimension_semantics<parallel>], iteration_bounds = array<i64: 1>, scalar_prefetch = 0 : i64, scratch_operands = 0 : i64, tpu.core_type = #tpu.core_type<tc>, window_params = [{transform_indices = @transform_0, window_bounds = array<i64: 16, 128>}, {transform_indices = @transform_1, window_bounds = array<i64: 16, 128>}]} {
    %c0 = arith.constant 0 : index
    %c0_0 = arith.constant 0 : index
    %0 = vector.load %arg1[%c0, %c0_0] : memref<16x128xf32, #tpu.memory_space<vmem>>, vector<16x128xf32>
    %cst = arith.constant 3.000000e+00 : f32
    %1 = vector.broadcast %cst : f32 to vector<16x128xf32>
    %2 = arith.addf %0, %1 : vector<16x128xf32>
    %cst_1 = arith.constant 0.000000e+00 : f32
    %cst_2 = arith.constant 6.000000e+00 : f32
    %3 = vector.broadcast %cst_1 : f32 to vector<16x128xf32>
    %4 = arith.maximumf %3, %2 : vector<16x128xf32>
    %5 = vector.broadcast %cst_2 : f32 to vector<16x128xf32>
    %6 = arith.minimumf %5, %4 : vector<16x128xf32>
    %cst_3 = arith.constant 0.166666672 : f32
    %7 = vector.broadcast %cst_3 : f32 to vector<16x128xf32>
    %8 = arith.mulf %6, %7 : vector<16x128xf32>
    %c0_4 = arith.constant 0 : index
    %c0_5 = arith.constant 0 : index
    %9 = vector.load %arg2[%c0_4, %c0_5] : memref<16x128xf32, #tpu.memory_space<vmem>>, vector<16x128xf32>
    tpu.vector_store %arg2[%c0_4, %c0_5], %8 {strides = array<i32>} : memref<16x128xf32, #tpu.memory_space<vmem>>, vector<16x128xf32>,
    return
  }
  func.func @transform_0(%arg0: i32) -> (i32, i32) {
    %c0_i32 = arith.constant 0 : i32
    %c0_i32_0 = arith.constant 0 : i32
    return %arg0, %c0_i32 : i32, i32
  }
  func.func @transform_1(%arg0: i32) -> (i32, i32) {
    %c0_i32 = arith.constant 0 : i32
    %c0_i32_0 = arith.constant 0 : i32
    return %arg0, %c0_i32 : i32, i32
  }
}

</mosaic_0001>

<bundles_post_ra>
// kernel: tpu_custom_call.1
= control target key start
LH: loop header
LB: loop body
LE: loop exit
PB: predicated region body
PF: predicated region fallthrough
CT: control target
= control target key end

     0   :  { %6 = vsyncpa [#allocation3], 0  ;;  %s148_s0 = inlined_call_operand.hbm [shape: f32[16,128], index: 0, kind: input, shape index: {}]   ;;  %s149_s1 = inlined_call_operand.hbm [shape: f32[16,128], index: 1, kind: output, shape index: {}]  }
   0x1   :  { %7 = vsyncpa [#allocation4], 0  ;;  %s104_s6 = smov [#allocation2]   ;;  %s56_s10 = scalar_lea.hbm %s148_s0, 256 }
   0x2   :  { %s13_s7 = sshll.u32 %s104_s6, 4  ;;  %p57_p0 = scmp.ne.s32.totalorder %s148_s0, %s56_s10  ;;  %s14_s7 = int_to_ptr.vmem [resolvable:$true] %s13_s7 }
   0x3   :  { %p60_p1 = scmp.lt.u32.totalorder %s56_s10, %s148_s0 }
   0x5   :  { %p62_p2 = pnand %p60_p1, %p57_p0 }
   0x7   :  { %65 = shalt.err (!%p62_p2)
}
   0x8   :  { %s66_s15 = scalar_lea.vmem %s14_s7, 256  ;;  %p71_p4 = scmp.lt.s32.totalorder %s14_s7, %s14_s7 }
   0x9   :  { %p67_p3 = scmp.ne.s32.totalorder %s14_s7, %s66_s15  ;;  %p72_p5 = scmp.lt.s32.totalorder %s66_s15, %s66_s15 }
   0xb   :  { %p73_p6 = por %p72_p5, %p71_p4 }
   0xd   :  { %p74_p7 = pnand %p73_p6, %p67_p3 }
   0xf   :  { %77 = shalt.err (!%p74_p7)
}
  0x10   :  { %s105_s16 = smov 128   ;;  %s106_s17 = smov 8  }
  0x11   :  { %19 = dma.hbm_to_vmem [thread:$0]  %s148_s0, 256, %s14_s7, [#allocation3], %s105_s16, %s105_s16, %s106_s17  }
  0x12   :  { %100 = dma.done.wait [#allocation3], 256  }
  0x13   :  { %101 = vsyncadd [#allocation3], 4294967040  ;;  %v23_v0 = vld [vmem:[#allocation2] sm:$0xff]  ;;  %v24_v1 = vld [vmem:[#allocation2 + $0x8] sm:$0xff]  ;;  %s107_s20 = smov [#allocation5]  }
  0x14   :  { %v25_v2 = vadd.f32 3.0, %v23_v0  ;;  %v26_v3 = vadd.f32 3.0, %v24_v1  ;;  %s40_s21 = sshll.u32 %s107_s20, 4  ;;  %s41_s21 = int_to_ptr.vmem [resolvable:$true] %s40_s21 }
  0x15   :  { %s78_s22 = scalar_lea.vmem %s41_s21, 256  ;;  %p83_p9 = scmp.lt.s32.totalorder %s41_s21, %s41_s21 }
  0x16   :  { %v27_v4 = vmax.f32 %v25_v2, 0.0  ;;  %v28_v5 = vmax.f32 %v26_v3, 0.0  ;;  %p79_p8 = scmp.ne.s32.totalorder %s41_s21, %s78_s22  ;;  %p84_p10 = scmp.lt.s32.totalorder %s78_s22, %s78_s22 }
  0x18   :  { %v29_v6 = vmin.f32 %v27_v4, 6.0  ;;  %v30_v7 = vmin.f32 %v28_v5, 6.0  ;;  %p85_p11 = por %p84_p10, %p83_p9 }
  0x1a   :  { %v31_v8 = vmul.f32 0.16666667, %v29_v6  ;;  %v32_v9 = vmul.f32 0.16666667, %v30_v7  ;;  %p86_p12 = pnand %p85_p11, %p79_p8 }
  0x1c   :  { %33 = vst [vmem:[#allocation5] sm:$0xff] %v31_v8  ;;  %34 = vst [vmem:[#allocation5 + $0x8] sm:$0xff] %v32_v9 }
  0x1d   :  { %89 = shalt.err (!%p86_p12)
}
  0x1e   :  { %s90_s24 = scalar_lea.hbm %s149_s1, 256 }
  0x1f   :  { %p91_p13 = scmp.ne.s32.totalorder %s149_s1, %s90_s24  ;;  %p94_p0 = scmp.lt.u32.totalorder %s90_s24, %s149_s1 }
  0x21   :  { %p96_p1 = pnand %p94_p0, %p91_p13 }
  0x23   :  { %99 = shalt.err (!%p96_p1)
}
  0x24   :  { %46 = dma.vmem_to_hbm [thread:$0]  %s41_s21, 256, %s149_s1, [#allocation4], %s105_s16, %s105_s16, %s106_s17  }
  0x25   :  { %102 = dma.done.wait [#allocation4], 256  }
  0x26   :  { %103 = vsyncadd [#allocation4], 4294967040 }
  0x27   :  { %50 = vsyncpa [#allocation3], 1 }
  0x28   :  { %51 = vsyncpa [#allocation4], 1 }

</bundles_post_ra>
